<compile_context>
chip_gen: v7x
topology: tpu7x:2x2x1
jax: 0.10.0
libtpu: 0.0.40
codegen_flags: <defaults>
</compile_context>

<pallas_src>
import functools

import jax
import jax.numpy as jnp
from jax import lax
from jax.experimental import pallas as pl
from jax.experimental.pallas import tpu as pltpu


def _vq_kernel(n_true, k_chunk, num_k_chunks, use_bf16_dist,
               x_ref, half_wsq_ref, w_ref, *rest):
    if use_bf16_dist:
        wd_ref, q_ref, idx_ref, sse_ref = rest      # extra resident bf16 codebook
    else:
        q_ref, idx_ref, sse_ref = rest
        wd_ref = w_ref

    tn, d = x_ref.shape
    x = x_ref[...]
    x_f32 = x.astype(jnp.float32)
    dist_dtype = jnp.bfloat16 if use_bf16_dist else jnp.float32
    xd = x_f32.astype(dist_dtype)

    # Contract D of both operands (trans_b): no transposed copy of the codebook.
    dn = (((1,), (1,)), ((), ()))

    if num_k_chunks == 1:
        # ---- small / medium codebook: one full-K pass (demo path) ----------
        xw = lax.dot_general(xd, wd_ref[...], dn,
                             preferred_element_type=jnp.float32)        # (tn, K)
        dist = half_wsq_ref[...] - xw                                    # (tn, K)
        best_idx = jnp.argmin(dist, axis=1).astype(jnp.int32)            # (tn,)
        onehot = (lax.broadcasted_iota(jnp.int32, dist.shape, 1)
                  == best_idx[:, None]).astype(jnp.float32)
        q = jnp.dot(onehot, w_ref[...], preferred_element_type=jnp.float32)
    else:
        # ---- large codebook: chunk K, carry a running (min, argmin) --------
        unroll = bool(num_k_chunks <= 8)

        def pass1(c, carry):
            best_val, best_i = carry
            start = pl.multiple_of(c * k_chunk, k_chunk)
            w_c = wd_ref[pl.ds(start, k_chunk), :]                       # (kc, D)
            hw_c = half_wsq_ref[:, pl.ds(start, k_chunk)]                # (1, kc)
            xw = lax.dot_general(xd, w_c, dn,
                                 preferred_element_type=jnp.float32)     # (tn, kc)
            distc = hw_c - xw
            cmin = jnp.min(distc, axis=1, keepdims=True)                  # (tn, 1)
            carg = jnp.argmin(distc, axis=1).astype(jnp.int32)[:, None] + start
            take = cmin < best_val          # strict '<': keep first minimum (torch)
            return (jnp.where(take, cmin, best_val),
                    jnp.where(take, carg, best_i))

        best_val0 = jnp.full((tn, 1), jnp.finfo(jnp.float32).max, jnp.float32)
        best_i0 = jnp.zeros((tn, 1), jnp.int32)
        _, best_i2 = lax.fori_loop(0, num_k_chunks, pass1,
                                   (best_val0, best_i0), unroll=unroll)

        def pass2(c, acc):
            start = pl.multiple_of(c * k_chunk, k_chunk)
            w_c = w_ref[pl.ds(start, k_chunk), :]                         # (kc, D) f32
            local = best_i2 - start
            onehot = (lax.broadcasted_iota(jnp.int32, (tn, k_chunk), 1)
                      == local).astype(jnp.float32)
            return acc + jnp.dot(onehot, w_c, preferred_element_type=jnp.float32)

        q = lax.fori_loop(0, num_k_chunks, pass2,
                          jnp.zeros((tn, d), jnp.float32), unroll=unroll)
        best_idx = best_i2[:, 0]

    q_ref[...] = q.astype(q_ref.dtype)
    # Lane-dense index store: (8, tn//8) block instead of masked (tn, 1) stores.
    idx_ref[...] = best_idx.reshape(idx_ref.shape)

    # Per-tile SSE partial for the commitment loss; padded rows masked out.
    row = (pl.program_id(0) * tn
           + lax.broadcasted_iota(jnp.int32, (tn, 1), 0))                 # (tn, 1)
    diff = jnp.where(row < n_true, q - x_f32, 0.0)                        # (tn, D)
    sq = diff * diff
    # Layout-preserving major-axis split: all 8 sublanes carry real partials.
    sse_ref[...] = sq.reshape(tn // 8, 8, d).sum(axis=0)                  # (8, D)


def _round_up(v, m):
    return ((v + m - 1) // m) * m


@functools.partial(jax.jit, static_argnames=("commitment_cost", "tile_n",
                                              "max_k_chunk", "use_bf16_dist"))
def vector_quantizer_ema_forward(inputs, codebook, *, commitment_cost=0.25,
                                 tile_n=1024, max_k_chunk=2048,
                                 use_bf16_dist=None):
    """Eval-mode forward of VectorQuantizerEMA.

    inputs:   (N, D) flattened latents
    codebook: (K, D) codebook
    returns:  (quantized (N, D), loss scalar, encoding_indices (N,) int32)
    """
    N, D = inputs.shape
    K, D2 = codebook.shape
    assert D == D2
    assert tile_n > 0 and tile_n % 128 == 0
    assert max_k_chunk > 0 and max_k_chunk % 128 == 0

    # bf16 distance matmul only where it dominates (large K); keeps small-K
    # argmin numerics tight vs an f32 reference.
    if use_bf16_dist is None:
        use_bf16_dist = K >= 1024

    # ---- N tiling: big tiles, but >= 2 tiles for small launches so both
    # v7x TensorCores get work (grid axis is "parallel").
    if N > tile_n:
        tn = tile_n
    else:
        tn = min(tile_n, max(128, _round_up(pl.cdiv(N, 2), 128)))
    num_tiles = pl.cdiv(N, tn)
    n_pad = num_tiles * tn
    x = inputs if n_pad == N else jnp.pad(inputs, ((0, n_pad - N), (0, 0)))

    # ---- K chunking: bound (tn, K) intermediates to (tn, k_chunk).
    if K <= max_k_chunk:
        k_chunk, num_k_chunks, k_pad = K, 1, K
    else:
        k_chunk = max_k_chunk
        num_k_chunks = pl.cdiv(K, k_chunk)
        k_pad = num_k_chunks * k_chunk

    # Hoisted codebook row half-norms (0.5*|w|^2), computed once in the wrapper.
    w_f32 = codebook.astype(jnp.float32)
    half_wsq = 0.5 * jnp.sum(w_f32 * w_f32, axis=1)[None, :]              # (1, K)
    if k_pad != K:
        w_f32 = jnp.pad(w_f32, ((0, k_pad - K), (0, 0)))
        # Padded code rows get a huge half-norm so they can never win the argmin.
        half_wsq = jnp.pad(half_wsq, ((0, 0), (0, k_pad - K)),
                           constant_values=1e30)

    # Residents (|w|^2, codebook) are single-buffered when big enough to matter;
    # at demo sizes the default double buffer is a few KiB and not worth the
    # extra lowering constraint.
    big_resident = k_pad * D * 4 >= 2 * 1024 * 1024
    resident_mode = pl.Buffered(1) if big_resident else None

    def resident_spec(shape):
        return pl.BlockSpec(shape, lambda i: (0, 0), pipeline_mode=resident_mode)

    operands = [x, half_wsq, w_f32]
    in_specs = [pl.BlockSpec((tn, D), lambda i: (i, 0)),                  # x tile
                resident_spec((1, k_pad)),                                # 0.5*|w|^2
                resident_spec((k_pad, D))]                                # codebook f32
    if use_bf16_dist:
        operands.append(w_f32.astype(jnp.bfloat16))                       # hoisted cast
        in_specs.append(resident_spec((k_pad, D)))

    # ---- Explicit VMEM budget (floor 32 MiB so small configs always compile).
    in_bytes = jnp.dtype(inputs.dtype).itemsize
    resid_bufs = 1 if big_resident else 2
    est = (2 * 2 * tn * D * in_bytes                      # x + quantized double buffers
           + 2 * tn * 4 + 2 * 8 * D * 4                   # idx + sse double buffers
           + resid_bufs * (k_pad * 4 + k_pad * D * 4
                           + (k_pad * D * 2 if use_bf16_dist else 0))
           + 3 * tn * k_chunk * 4                         # dist / onehot chunk temps
           + 3 * tn * D * 4)                              # gather accumulator / diff
    vmem_limit = int(max(32 * 1024 * 1024, min(int(est * 1.25), 100 * 1024 * 1024)))

    kernel = functools.partial(_vq_kernel, N, k_chunk, num_k_chunks, use_bf16_dist)

    quantized, idx, sse = pl.pallas_call(
        kernel,
        out_shape=(
            jax.ShapeDtypeStruct((n_pad, D), inputs.dtype),               # quantized
            jax.ShapeDtypeStruct((num_tiles * 8, tn // 8), jnp.int32),    # indices
            jax.ShapeDtypeStruct((num_tiles * 8, D), jnp.float32),        # SSE partials
        ),
        grid_spec=pltpu.PrefetchScalarGridSpec(
            num_scalar_prefetch=0,
            grid=(num_tiles,),
            in_specs=in_specs,
            out_specs=(
                pl.BlockSpec((tn, D), lambda i: (i, 0)),
                pl.BlockSpec((8, tn // 8), lambda i: (i, 0)),
                pl.BlockSpec((8, D), lambda i: (i, 0)),
            ),
        ),
        compiler_params=pltpu.CompilerParams(
            dimension_semantics=("parallel",),
            vmem_limit_bytes=vmem_limit),
    )(*operands)

    # F.mse_loss(quantized.detach(), inputs): divide by the TRUE element count.
    e_latent_loss = jnp.sum(sse) / jnp.float32(N * D)
    loss = jnp.float32(commitment_cost) * e_latent_loss

    encoding_indices = idx.reshape(-1)[:N]
    quantized = quantized[:N]
    # Straight-through: forward value of inputs + (quantized - inputs).detach()
    # is `quantized`.
    return quantized, loss, encoding_indices


def _reference(inputs, codebook, commitment_cost=0.25):
    d = (jnp.sum(inputs ** 2, axis=1, keepdims=True)
         + jnp.sum(codebook ** 2, axis=1)
         - 2.0 * inputs @ codebook.T)
    idx = jnp.argmin(d, axis=1)
    q = codebook[idx]
    loss = commitment_cost * jnp.mean((q - inputs) ** 2)
    return q, loss, idx


def _make_latents(key, codebook, n, noise=0.25):
    """Latents near codebook rows: the nearest code has a large margin, so
    index comparisons are robust to TPU matmul rounding in either impl."""
    k_sel, k_noise = jax.random.split(key)
    sel = jax.random.randint(k_sel, (n,), 0, codebook.shape[0])
    eps = noise * jax.random.normal(k_noise, (n, codebook.shape[1]),
                                    dtype=jnp.float32)
    return codebook[sel] + eps


def _check(tag, out, ref, q_tol=2e-2, loss_rtol=1e-2):
    q, loss, idx = out
    q_ref, loss_ref, idx_ref = ref
    assert idx.shape == idx_ref.shape, tag
    assert bool(jnp.all(idx == idx_ref)), f"index mismatch ({tag})"
    assert jnp.allclose(q, q_ref, atol=q_tol, rtol=0.0), f"quantized mismatch ({tag})"
    assert jnp.allclose(loss, loss_ref, rtol=loss_rtol, atol=1e-4), f"loss mismatch ({tag})"


if __name__ == "__main__":
    # Module-consistent small shapes: B=2, embedding_dim=32, H=W=16 -> N=512.
    codebook_size = 64
    embedding_dim = 32
    B, H, W = 2, 16, 16

    key = jax.random.PRNGKey(0)
    k_cb, k_x1, k_x2, k_cb3, k_x3 = jax.random.split(key, 5)

    # codebook.weight.data.normal_() -> standard normal init.
    codebook = jax.random.normal(k_cb, (codebook_size, embedding_dim),
                                 dtype=jnp.float32)

    # Conv-style latents (B, C, H, W) -> NHWC -> flattened (N, D).
    lat = _make_latents(k_x1, codebook, B * H * W)
    x_nchw = jnp.transpose(lat.reshape(B, H, W, embedding_dim), (0, 3, 1, 2))
    inputs = jnp.transpose(x_nchw, (0, 2, 3, 1)).reshape(-1, embedding_dim)

    # 1) Small config (two 256-row tiles, f32 distances, single K chunk).
    out1 = vector_quantizer_ema_forward(inputs, codebook, commitment_cost=0.25)
    jax.block_until_ready(out1)
    _check("small", out1, _reference(inputs, codebook))

    # 2) Ragged N (multi-tile grid + padding/mask path).
    inputs2 = _make_latents(k_x2, codebook, 2000)
    out2 = vector_quantizer_ema_forward(inputs2, codebook)
    jax.block_until_ready(out2)
    _check("ragged", out2, _reference(inputs2, codebook))

    # 3) Chunked-K path (force 4 K-chunks of 128 with a K=512 codebook, f32).
    codebook3 = jax.random.normal(k_cb3, (512, embedding_dim), dtype=jnp.float32)
    inputs3 = _make_latents(k_x3, codebook3, 512)
    out3 = vector_quantizer_ema_forward(inputs3, codebook3, max_k_chunk=128)
    jax.block_until_ready(out3)
    _check("k-chunked", out3, _reference(inputs3, codebook3))

    # 4) bf16 distance-matmul path (hoisted bf16 codebook operand).
    out4 = vector_quantizer_ema_forward(inputs, codebook, use_bf16_dist=True)
    jax.block_until_ready(out4)
    _check("bf16-dist", out4, _reference(inputs, codebook))

    print("KERNEL_OK")
</pallas_src>

<mosaic_0001>
module attributes {stable_mosaic.version = 11 : i64} {
  func.func @_vq_kernel(%arg0: i32, %arg1: memref<256x32xf32, #tpu.memory_space<vmem>>, %arg2: memref<1x64xf32, #tpu.memory_space<vmem>>, %arg3: memref<64x32xf32, #tpu.memory_space<vmem>>, %arg4: memref<256x32xf32, #tpu.memory_space<vmem>>, %arg5: memref<8x32xi32, #tpu.memory_space<vmem>>, %arg6: memref<8x32xf32, #tpu.memory_space<vmem>>) attributes {dimension_semantics = [#tpu.dimension_semantics<parallel>], iteration_bounds = array<i64: 2>, scalar_prefetch = 0 : i64, scratch_operands = 0 : i64, tpu.core_type = #tpu.core_type<tc>, window_params = [{transform_indices = @transform_0, window_bounds = array<i64: 256, 32>}, {pipeline_mode = #tpu.pipeline_mode<synchronous>, transform_indices = @transform_1, window_bounds = array<i64: 1, 64>}, {pipeline_mode = #tpu.pipeline_mode<synchronous>, transform_indices = @transform_2, window_bounds = array<i64: 64, 32>}, {transform_indices = @transform_3, window_bounds = array<i64: 256, 32>}, {transform_indices = @transform_4, window_bounds = array<i64: 8, 32>}, {transform_indices = @transform_5, window_bounds = array<i64: 8, 32>}]} {
    %c0 = arith.constant 0 : index
    %c0_0 = arith.constant 0 : index
    %0 = vector.load %arg1[%c0, %c0_0] : memref<256x32xf32, #tpu.memory_space<vmem>>, vector<256x32xf32>
    %c0_1 = arith.constant 0 : index
    %c0_2 = arith.constant 0 : index
    %1 = vector.load %arg3[%c0_1, %c0_2] : memref<64x32xf32, #tpu.memory_space<vmem>>, vector<64x32xf32>
    %cst = arith.constant dense<0.000000e+00> : vector<256x64xf32>
    %2 = tpu.matmul %0, %1, %cst {dimension_numbers = #tpu.dot_dimension_numbers<[1], [1], [0], [0], [0, 0, 1, 0], [], []>} : vector<256x32xf32>, vector<64x32xf32>, vector<256x64xf32> -> vector<256x64xf32>
    %c0_3 = arith.constant 0 : index
    %c0_4 = arith.constant 0 : index
    %3 = vector.load %arg2[%c0_3, %c0_4] : memref<1x64xf32, #tpu.memory_space<vmem>>, vector<1x64xf32>
    %4 = vector.broadcast %3 : vector<1x64xf32> to vector<256x64xf32>
    %5 = arith.subf %4, %2 : vector<256x64xf32>
    %6 = tpu.reduce_index %5 {axis = 1 : i32, kind = #tpu.reduction_kind<arg_min>} : vector<256x64xf32> -> vector<256xi32>
    %7 = tpu.iota {dimensions = array<i32: 1>} : vector<256x64xi32>
    %8 = vector.shape_cast %6 : vector<256xi32> to vector<256x1xi32>
    %9 = vector.broadcast %8 : vector<256x1xi32> to vector<256x64xi32>
    %10 = arith.cmpi eq, %7, %9 : vector<256x64xi32>
    %11 = arith.extui %10 : vector<256x64xi1> to vector<256x64xi32>
    %12 = arith.sitofp %11 : vector<256x64xi32> to vector<256x64xf32>
    %c0_5 = arith.constant 0 : index
    %c0_6 = arith.constant 0 : index
    %13 = vector.load %arg3[%c0_5, %c0_6] : memref<64x32xf32, #tpu.memory_space<vmem>>, vector<64x32xf32>
    %cst_7 = arith.constant dense<0.000000e+00> : vector<256x32xf32>
    %14 = tpu.matmul %12, %13, %cst_7 {dimension_numbers = #tpu.dot_dimension_numbers<[1], [0], [0], [1], [0, 0, 1, 1], [], []>} : vector<256x64xf32>, vector<64x32xf32>, vector<256x32xf32> -> vector<256x32xf32>
    %c0_8 = arith.constant 0 : index
    %c0_9 = arith.constant 0 : index
    %15 = vector.load %arg4[%c0_8, %c0_9] : memref<256x32xf32, #tpu.memory_space<vmem>>, vector<256x32xf32>
    tpu.vector_store %arg4[%c0_8, %c0_9], %14 {strides = array<i32>} : memref<256x32xf32, #tpu.memory_space<vmem>>, vector<256x32xf32>,
    %16 = vector.shape_cast %6 : vector<256xi32> to vector<8x32xi32>
    %c0_10 = arith.constant 0 : index
    %c0_11 = arith.constant 0 : index
    %17 = vector.load %arg5[%c0_10, %c0_11] : memref<8x32xi32, #tpu.memory_space<vmem>>, vector<8x32xi32>
    tpu.vector_store %arg5[%c0_10, %c0_11], %16 {strides = array<i32>} : memref<8x32xi32, #tpu.memory_space<vmem>>, vector<8x32xi32>,
    %c256_i32 = arith.constant 256 : i32
    %18 = arith.muli %arg0, %c256_i32 : i32
    %19 = tpu.iota {dimensions = array<i32: 0>} : vector<256x1xi32>
    %20 = vector.broadcast %18 : i32 to vector<256x1xi32>
    %21 = arith.addi %20, %19 : vector<256x1xi32>
    %c512_i32 = arith.constant 512 : i32
    %22 = vector.broadcast %c512_i32 : i32 to vector<256x1xi32>
    %23 = arith.cmpi slt, %21, %22 : vector<256x1xi32>
    %24 = arith.subf %14, %0 : vector<256x32xf32>
    %cst_12 = arith.constant 0.000000e+00 : f32
    %25 = vector.shape_cast %23 : vector<256x1xi1> to vector<256x1xi1>
    %26 = vector.broadcast %25 : vector<256x1xi1> to vector<256x32xi1>
    %27 = vector.broadcast %cst_12 : f32 to vector<256x32xf32>
    %28 = arith.select %26, %24, %27 : vector<256x32xi1>, vector<256x32xf32>
    %29 = arith.mulf %28, %28 : vector<256x32xf32>
    %30 = vector.shape_cast %29 : vector<256x32xf32> to vector<32x8x32xf32>
    %cst_13 = arith.constant dense<0.000000e+00> : vector<8x32xf32>
    %31 = vector.multi_reduction <add>, %30, %cst_13 [0] : vector<32x8x32xf32> to vector<8x32xf32>
    %c0_14 = arith.constant 0 : index
    %c0_15 = arith.constant 0 : index
    %32 = vector.load %arg6[%c0_14, %c0_15] : memref<8x32xf32, #tpu.memory_space<vmem>>, vector<8x32xf32>
    tpu.vector_store %arg6[%c0_14, %c0_15], %31 {strides = array<i32>} : memref<8x32xf32, #tpu.memory_space<vmem>>, vector<8x32xf32>,
    return
  }
  func.func @transform_0(%arg0: i32) -> (i32, i32) {
    %c0_i32 = arith.constant 0 : i32
    %c0_i32_0 = arith.constant 0 : i32
    return %arg0, %c0_i32 : i32, i32
  }
  func.func @transform_1(%arg0: i32) -> (i32, i32) {
    %c0_i32 = arith.constant 0 : i32
    %c0_i32_0 = arith.constant 0 : i32
    %c0_i32_1 = arith.constant 0 : i32
    return %c0_i32, %c0_i32_0 : i32, i32
  }
  func.func @transform_2(%arg0: i32) -> (i32, i32) {
    %c0_i32 = arith.constant 0 : i32
    %c0_i32_0 = arith.constant 0 : i32
    %c0_i32_1 = arith.constant 0 : i32
    return %c0_i32, %c0_i32_0 : i32, i32
  }
  func.func @transform_3(%arg0: i32) -> (i32, i32) {
    %c0_i32 = arith.constant 0 : i32
    %c0_i32_0 = arith.constant 0 : i32
    return %arg0, %c0_i32 : i32, i32
  }
  func.func @transform_4(%arg0: i32) -> (i32, i32) {
    %c0_i32 = arith.constant 0 : i32
    %c0_i32_0 = arith.constant 0 : i32
    return %arg0, %c0_i32 : i32, i32
  }
  func.func @transform_5(%arg0: i32) -> (i32, i32) {
    %c0_i32 = arith.constant 0 : i32
    %c0_i32_0 = arith.constant 0 : i32
    return %arg0, %c0_i32 : i32, i32
  }
}

</mosaic_0001>

<bundles_post_ra>
// kernel: vector_quantizer_ema_forward.1
= control target key start
LH: loop header
LB: loop body
LE: loop exit
PB: predicated region body
PF: predicated region fallthrough
CT: control target
= control target key end

     0   :  { %s2271_s18 = smov 0   ;;  %s3035_s0 = inlined_call_operand.vmem [shape: f32[512,32], index: 0, kind: input, shape index: {}]   ;;  %s3036_s1 = inlined_call_operand.vmem [shape: f32[1,64], index: 1, kind: input, shape index: {}]   ;;  %s3037_s2 = inlined_call_operand.vmem [shape: f32[64,32], index: 2, kind: input, shape index: {}]   ;;  %s3038_s3 = inlined_call_operand.vmem [shape: f32[512,32], index: 3, kind: output, shape index: {0}]   ;;  %s3039_s4 = inlined_call_operand.vmem [shape: s32[16,32], index: 4, kind: output, shape index: {1}]   ;;  %s3040_s5 = inlined_call_operand.vmem [shape: f32[16,32], index: 5, kind: output, shape index: {2}]  }
   0x1 LB: > { %s2277_s19 = sadd.s32 4294967295, %s2238_s18   ;;  %p1840_p0 = scmp.ge.s32.totalorder %s2238_s18, 1  ;;  %s2238_s18 = sphi %s2271_s18, %s16_s18  }
   0x2   : > { %p193_p1 = scmp.lt.s32.totalorder %s2238_s18, 3 }
   0x4   : > { %p194_p2 = pnand %p1840_p0, %p193_p1 }
   0x5   : > { %v281_v0 = vld [vmem:[%s3037_s2] sm:$0xff] (!%p194_p2)  ;;  %v282_v1 = vld [vmem:[%s3037_s2 + $0x8] sm:$0xff] (!%p194_p2)  ;;  %vm289_vm0 = vcmask (!%p194_p2), 261120   ;;  %v283_v2 = vld [vmem:[%s3037_s2 + $0x10] sm:$0xff] (!%p194_p2)  ;;  %s1841_s26 = sshll.u32 (!%p194_p2), %s2277_s19, 5  ;;  %vm674_vm2 = vcmask (!%p194_p2), 523264  }
   0x6   : > { %197 = sbr.rel (%p194_p2) target bundleno = 688 (0x2b0), region = 32  ;;  %v2163_v3 = vpack.c.bf16 (!%p194_p2), %v282_v1, %v281_v0  ;;  %vm2293_vm1 = vmpackc.low (!%p194_p2), %vm289_vm0, %vm289_vm0  ;;  %v284_v5 = vld [vmem:[%s3037_s2 + $0x18] sm:$0xff] (!%p194_p2)  ;;  %p230_p3 = scmp.lt.s32.totalorder (!%p194_p2), %s1841_s26, 63  ;;  %v285_v7 = vld [vmem:[%s3037_s2 + $0x20] sm:$0xff] (!%p194_p2) }
   0x7   : > { %v2169_v6 = vpack.c.bf16 (!%p194_p2), %v284_v5, %v283_v2  ;;  %v286_v8 = vld [vmem:[%s3037_s2 + $0x28] sm:$0xff] (!%p194_p2)  ;;  %v287_v11 = vld [vmem:[%s3037_s2 + $0x30] sm:$0xff] (!%p194_p2)  ;;  %v288_v12 = vld [vmem:[%s3037_s2 + $0x38] sm:$0xff] (!%p194_p2)  ;;  %p241_p4 = scmp.lt.s32.totalorder (!%p194_p2), %s2277_s19, 1  ;;  %s1952_s25 = sshll.u32 (!%p194_p2), %s2277_s19, 8 }
   0x8   : > { %2165 = vmatprep.subr.msk.bf16.mxu0 (!%p194_p2), %vm2293_vm1, %v2163_v3  ;;  %2188 = vmatprep.subr.bf16.mxu1 (!%p194_p2), %v2163_v3  ;;  %v2175_v9 = vpack.c.bf16 (!%p194_p2), %v286_v8, %v285_v7  ;;  %v2181_v13 = vpack.c.bf16 (!%p194_p2), %v288_v12, %v287_v11  ;;  %v2441_v45 = vld [vmem:[%s3036_s1] ss:$0 sm:$0xff] (!%p194_p2) }
   0x9   : > { %2168 = vmatpush3.bf16.xpose.msk.msra.mxu0 (!%p194_p2), %vm2293_vm1, %v2163_v3  ;;  %2190 = vmatpush3.bf16.msra.mxu1 (!%p194_p2), %v2163_v3 }
   0xa   : > { %2171 = vmatprep.subr.msk.bf16.mxu0 (!%p194_p2), %vm2293_vm1, %v2169_v6  ;;  %2192 = vmatprep.subr.bf16.mxu1 (!%p194_p2), %v2169_v6 }
   0xd   : > { %s3044_s26 = smov (!%p230_p3, %s1841_s26), 63  ;;  %2194 = vmatpush3.bf16.msra.mxu1 %v2169_v6 }
   0xe   : > { %s1842_s8 = sshll.u32 %s3044_s26, 3  ;;  %2196 = vmatprep.subr.bf16.mxu1 %v2175_v9 }
   0xf   : > { %s2320_s11 = scalar_lea.vmem %s3035_s0, %s1842_s8  ;;  %s2813_s29 = scalar_lea.vmem %s3038_s3, %s1842_s8 }
  0x10   : > { %v2323_v10 = vld [vmem:[%s2320_s11] sm:$0xff]  ;;  %v2344_v14 = vld [vmem:[%s2320_s11 + $0x8] sm:$0xff]  ;;  %v2347_v15 = vld [vmem:[%s2320_s11 + $0x10] sm:$0xff]  ;;  %s2761_s20 = scalar_select %p241_p4, %s2277_s19, 1 }
  0x11   : > { %2051 = vmatprep.mubr.msk.f32.mxu0 %vm289_vm0, %v2323_v10  ;;  %2174 = vmatpush3.bf16.xpose.msk.msra.mxu0 %vm2293_vm1, %v2169_v6  ;;  %v2354_v16 = vld [vmem:[%s2320_s11 + $0x18] sm:$0xff]  ;;  %v2357_v17 = vld [vmem:[%s2320_s11 + $0x20] sm:$0xff]  ;;  %v2364_v18 = vld [vmem:[%s2320_s11 + $0x28] sm:$0xff] }
  0x12   : > { %2198 = vmatpush3.bf16.msra.mxu1 %v2175_v9  ;;  %2177 = vmatprep.subr.msk.bf16.mxu0 %vm2293_vm1, %v2175_v9  ;;  %v2367_v19 = vld [vmem:[%s2320_s11 + $0x30] sm:$0xff]  ;;  %v2374_v20 = vld [vmem:[%s2320_s11 + $0x38] sm:$0xff]  ;;  %v2377_v21 = vld [vmem:[%s2320_s11 + $0x40] sm:$0xff]  ;;  %s1845_s21 = sshll.u32 %s2761_s20, 3 }
  0x13   : > { %2200 = vmatprep.subr.bf16.mxu1 %v2181_v13  ;;  %v2384_v22 = vld [vmem:[%s2320_s11 + $0x48] sm:$0xff]  ;;  %v2387_v23 = vld [vmem:[%s2320_s11 + $0x50] sm:$0xff]  ;;  %v2394_v24 = vld [vmem:[%s2320_s11 + $0x58] sm:$0xff]  ;;  %s244_s24 = scalar_lea.vmem %s3039_s4, %s1845_s21  ;;  %s248_s30 = scalar_lea.vmem %s3040_s5, %s1845_s21 }
  0x14   : > { %v261_v25 = vld [vmem:[%s2320_s11 + $0x60] sm:$0xff]  ;;  %v262_v26 = vld [vmem:[%s2320_s11 + $0x68] sm:$0xff]  ;;  %v263_v27 = vld [vmem:[%s2320_s11 + $0x70] sm:$0xff] }
  0x15   : > { %v264_v28 = vld [vmem:[%s2320_s11 + $0x78] sm:$0xff]  ;;  %v265_v29 = vld [vmem:[%s2320_s11 + $0x80] sm:$0xff]  ;;  %v266_v30 = vld [vmem:[%s2320_s11 + $0x88] sm:$0xff] }
  0x16   : > { %2202 = vmatpush3.bf16.msra.mxu1 %v2181_v13  ;;  %v267_v31 = vld [vmem:[%s2320_s11 + $0x90] sm:$0xff]  ;;  %v268_v32 = vld [vmem:[%s2320_s11 + $0x98] sm:$0xff]  ;;  %v269_v33 = vld [vmem:[%s2320_s11 + $0xa0] sm:$0xff] }
  0x17   : > { %v270_v34 = vld [vmem:[%s2320_s11 + $0xa8] sm:$0xff]  ;;  %v271_v35 = vld [vmem:[%s2320_s11 + $0xb0] sm:$0xff]  ;;  %v272_v36 = vld [vmem:[%s2320_s11 + $0xb8] sm:$0xff] }
  0x18   : > { %v273_v37 = vld [vmem:[%s2320_s11 + $0xc0] sm:$0xff]  ;;  %v274_v38 = vld [vmem:[%s2320_s11 + $0xc8] sm:$0xff]  ;;  %v275_v39 = vld [vmem:[%s2320_s11 + $0xd0] sm:$0xff] }
  0x19   : > { %2180 = vmatpush3.bf16.xpose.msk.msra.mxu0 %vm2293_vm1, %v2175_v9  ;;  %v276_v40 = vld [vmem:[%s2320_s11 + $0xd8] sm:$0xff]  ;;  %v277_v41 = vld [vmem:[%s2320_s11 + $0xe0] sm:$0xff]  ;;  %v278_v42 = vld [vmem:[%s2320_s11 + $0xe8] sm:$0xff] }
  0x1a   : > { %2183 = vmatprep.subr.msk.bf16.mxu0 %vm2293_vm1, %v2181_v13  ;;  %v279_v43 = vld [vmem:[%s2320_s11 + $0xf0] sm:$0xff]  ;;  %v280_v44 = vld [vmem:[%s2320_s11 + $0xf8] sm:$0xff] }
  0x21   : > { %2186 = vmatpush3.bf16.xpose.msk.msra.mxu0 %vm2293_vm1, %v2181_v13 }
  0x28   : > { %2052 = vmatmul.mubr.msk.f32.vlgmr.msra.gmra.mrb[0].mxu0 %vm289_vm0, %v2344_v14 }
  0x29   : > { %2054 = vmatprep.mubr.msk.f32.mxu0 %vm289_vm0, %v2347_v15 }
  0x2c   : > { %2055 = vmatmul.mubr.msk.f32.gmra.mrb[2].mxu0 %vm289_vm0, %v2354_v16 }
  0x2d   : > { %2057 = vmatprep.mubr.msk.f32.mxu0 %vm289_vm0, %v2357_v17 }
  0x30   : > { %2058 = vmatmul.mubr.msk.f32.gmra.mrb[4].mxu0 %vm289_vm0, %v2364_v18 }
  0x31   : > { %2060 = vmatprep.mubr.msk.f32.mxu0 %vm289_vm0, %v2367_v19 }
  0x34   : > { %2061 = vmatmul.mubr.msk.f32.gmra.mrb[6].mxu0 %vm289_vm0, %v2374_v20 }
  0x35   : > { %2063 = vmatprep.mubr.msk.f32.mxu0 %vm289_vm0, %v2377_v21 }
  0x38   : > { %2064 = vmatmul.mubr.msk.f32.gmra.mrb[8].mxu0 %vm289_vm0, %v2384_v22 }
  0x39   : > { %2066 = vmatprep.mubr.msk.f32.mxu0 %vm289_vm0, %v2387_v23 }
  0x3c   : > { %2067 = vmatmul.mubr.msk.f32.gmra.mrb[10].mxu0 %vm289_vm0, %v2394_v24 }
  0x3d   : > { %2069 = vmatprep.mubr.msk.f32.mxu0 %vm289_vm0, %v261_v25 }
  0x40   : > { %2070 = vmatmul.mubr.msk.f32.gmra.mrb[12].mxu0 %vm289_vm0, %v262_v26 }
  0x41   : > { %2072 = vmatprep.mubr.msk.f32.mxu0 %vm289_vm0, %v263_v27 }
  0x44   : > { %2073 = vmatmul.mubr.msk.f32.gmra.mrb[14].mxu0 %vm289_vm0, %v264_v28 }
  0x45   : > { %2075 = vmatprep.mubr.msk.f32.mxu0 %vm289_vm0, %v265_v29 }
  0x48   : > { %2076 = vmatmul.mubr.msk.f32.gmra.mrb[16].mxu0 %vm289_vm0, %v266_v30 }
  0x49   : > { %2078 = vmatprep.mubr.msk.f32.mxu0 %vm289_vm0, %v267_v31 }
  0x4c   : > { %2079 = vmatmul.mubr.msk.f32.gmra.mrb[18].mxu0 %vm289_vm0, %v268_v32 }
  0x4d   : > { %2081 = vmatprep.mubr.msk.f32.mxu0 %vm289_vm0, %v269_v33 }
  0x50   : > { %2082 = vmatmul.mubr.msk.f32.gmra.mrb[20].mxu0 %vm289_vm0, %v270_v34 }
  0x51   : > { %2084 = vmatprep.mubr.msk.f32.mxu0 %vm289_vm0, %v271_v35 }
  0x54   : > { %2085 = vmatmul.mubr.msk.f32.gmra.mrb[22].mxu0 %vm289_vm0, %v272_v36 }
  0x55   : > { %2087 = vmatprep.mubr.msk.f32.mxu0 %vm289_vm0, %v273_v37 }
  0x58   : > { %2088 = vmatmul.mubr.msk.f32.gmra.mrb[24].mxu0 %vm289_vm0, %v274_v38 }
  0x59   : > { %2090 = vmatprep.mubr.msk.f32.mxu0 %vm289_vm0, %v275_v39 }
  0x5c   : > { %2091 = vmatmul.mubr.msk.f32.gmra.mrb[26].mxu0 %vm289_vm0, %v276_v40 }
  0x5d   : > { %2093 = vmatprep.mubr.msk.f32.mxu0 %vm289_vm0, %v277_v41 }
  0x60   : > { %2094 = vmatmul.mubr.msk.f32.gmra.mrb[28].mxu0 %vm289_vm0, %v278_v42 }
  0x61   : > { %2096 = vmatprep.mubr.msk.f32.mxu0 %vm289_vm0, %v279_v43 }
  0x64   : > { %2097 = vmatmul.mubr.msk.f32.gmra.mrb[30].mxu0 %vm289_vm0, %v280_v44 }
  0xfb   : > { %v2053_v46 = vpop.f32.mrb[0].mxu0 }
  0xfc   : > { %v476_v47 = vpop.f32.mrb[1].mxu0  ;;  %v643_v49 = vsub.f32 %v2441_v45, %v2053_v46 }
  0xfd   : > { %v642_v48 = vsub.f32 %v2441_v45, %v476_v47 }
  0xfe   : > { %v678_v55 = vsel %vm674_vm2, %v643_v49, inf }
  0xff   : > { %v2056_v50 = vpop.f32.mrb[2].mxu0  ;;  %v675_v51 = vsel %vm674_vm2, %v642_v48, inf }
 0x100   : > { %676 = vmin.index.xlane.f32.xlu0 %v675_v51  ;;  %v486_v52 = vpop.f32.mrb[3].mxu0  ;;  %v645_v54 = vsub.f32 %v2441_v45, %v2056_v50 }
 0x101   : > { %v644_v53 = vsub.f32 %v2441_v45, %v486_v52 }
 0x102   : > { %v684_v61 = vsel %vm674_vm2, %v645_v54, inf }
 0x103   : > { %v681_v56 = vsel %vm674_vm2, %v644_v53, inf  ;;  %v2059_v57 = vpop.f32.mrb[4].mxu0 }
 0x104   : > { %679 = vmin.index.xlane.f32.xlu0 %v678_v55  ;;  %682 = vmin.index.xlane.f32.xlu1 %v681_v56  ;;  %v496_v58 = vpop.f32.mrb[5].mxu0  ;;  %v647_v60 = vsub.f32 %v2441_v45, %v2059_v57 }
 0x105   : > { %v646_v59 = vsub.f32 %v2441_v45, %v496_v58 }
 0x106   : > { %v690_v3 = vsel %vm674_vm2, %v647_v60, inf }
 0x107   : > { %v2062_v62 = vpop.f32.mrb[6].mxu0  ;;  %v687_v63 = vsel %vm674_vm2, %v646_v59, inf }
 0x108   : > { %685 = vmin.index.xlane.f32.xlu1 %v684_v61  ;;  %688 = vmin.index.xlane.f32.xlu0 %v687_v63  ;;  %v506_v0 = vpop.f32.mrb[7].mxu0  ;;  %v649_v2 = vsub.f32 %v2441_v45, %v2062_v62 }
 0x109   : > { %v648_v1 = vsub.f32 %v2441_v45, %v506_v0 }
 0x10a   : > { %v696_v9 = vsel %vm674_vm2, %v649_v2, inf }
 0x10b   : > { %v2065_v4 = vpop.f32.mrb[8].mxu0  ;;  %v693_v5 = vsel %vm674_vm2, %v648_v1, inf }
 0x10c   : > { %691 = vmin.index.xlane.f32.xlu1 %v690_v3  ;;  %694 = vmin.index.xlane.f32.xlu0 %v693_v5  ;;  %v516_v6 = vpop.f32.mrb[9].mxu0  ;;  %v651_v8 = vsub.f32 %v2441_v45, %v2065_v4 }
 0x10d   : > { %v650_v7 = vsub.f32 %v2441_v45, %v516_v6 }
 0x10e   : > { %v702_v27 = vsel %vm674_vm2, %v651_v8, inf }
 0x10f   : > { %v2068_v11 = vpop.f32.mrb[10].mxu0  ;;  %v699_v12 = vsel %vm674_vm2, %v650_v7, inf }
 0x110   : > { %697 = vmin.index.xlane.f32.xlu1 %v696_v9  ;;  %700 = vmin.index.xlane.f32.xlu0 %v699_v12  ;;  %v526_v13 = vpop.f32.mrb[11].mxu0  ;;  %v653_v26 = vsub.f32 %v2441_v45, %v2068_v11 }
 0x111   : > { %v652_v25 = vsub.f32 %v2441_v45, %v526_v13 }
 0x112   : > { %v708_v33 = vsel %vm674_vm2, %v653_v26, inf }
 0x113   : > { %v2071_v28 = vpop.f32.mrb[12].mxu0  ;;  %v705_v29 = vsel %vm674_vm2, %v652_v25, inf }
 0x114   : > { %703 = vmin.index.xlane.f32.xlu1 %v702_v27  ;;  %706 = vmin.index.xlane.f32.xlu0 %v705_v29  ;;  %v536_v30 = vpop.f32.mrb[13].mxu0  ;;  %v655_v32 = vsub.f32 %v2441_v45, %v2071_v28 }
 0x115   : > { %v654_v31 = vsub.f32 %v2441_v45, %v536_v30 }
 0x116   : > { %v714_v39 = vsel %vm674_vm2, %v655_v32, inf }
 0x117   : > { %v2074_v34 = vpop.f32.mrb[14].mxu0  ;;  %v711_v35 = vsel %vm674_vm2, %v654_v31, inf }
 0x118   : > { %709 = vmin.index.xlane.f32.xlu1 %v708_v33  ;;  %712 = vmin.index.xlane.f32.xlu0 %v711_v35  ;;  %v546_v36 = vpop.f32.mrb[15].mxu0  ;;  %v657_v38 = vsub.f32 %v2441_v45, %v2074_v34 }
 0x119   : > { %v656_v37 = vsub.f32 %v2441_v45, %v546_v36 }
 0x11a   : > { %v720_v46 = vsel %vm674_vm2, %v657_v38, inf }
 0x11b   : > { %v2077_v40 = vpop.f32.mrb[16].mxu0  ;;  %v717_v41 = vsel %vm674_vm2, %v656_v37, inf }
 0x11c   : > { %715 = vmin.index.xlane.f32.xlu1 %v714_v39  ;;  %718 = vmin.index.xlane.f32.xlu0 %v717_v41  ;;  %v556_v42 = vpop.f32.mrb[17].mxu0  ;;  %v659_v44 = vsub.f32 %v2441_v45, %v2077_v40  ;;  %v771_v39 = vlaneseq }
 0x11d   : > { %v658_v43 = vsub.f32 %v2441_v45, %v556_v42  ;;  %v2240_v42 = vmov 0.0  }
 0x11e   : > { %v726_v52 = vsel %vm674_vm2, %v659_v44, inf  ;;  %v2508_v40 = vand.u32 127, %v771_v39 }
 0x11f   : > { %v2080_v47 = vpop.f32.mrb[18].mxu0  ;;  %v723_v48 = vsel %vm674_vm2, %v658_v43, inf }
 0x120   : > { %721 = vmin.index.xlane.f32.xlu1 %v720_v46  ;;  %724 = vmin.index.xlane.f32.xlu0 %v723_v48  ;;  %v566_v49 = vpop.f32.mrb[19].mxu0  ;;  %v661_v51 = vsub.f32 %v2441_v45, %v2080_v47 }
 0x121   : > { %v660_v50 = vsub.f32 %v2441_v45, %v566_v49 }
 0x122   : > { %v732_v58 = vsel %vm674_vm2, %v661_v51, inf }
 0x123   : > { %v2083_v53 = vpop.f32.mrb[20].mxu0  ;;  %v729_v54 = vsel %vm674_vm2, %v660_v50, inf }
 0x124   : > { %727 = vmin.index.xlane.f32.xlu1 %v726_v52  ;;  %730 = vmin.index.xlane.f32.xlu0 %v729_v54  ;;  %v576_v55 = vpop.f32.mrb[21].mxu0  ;;  %v663_v57 = vsub.f32 %v2441_v45, %v2083_v53 }
 0x125   : > { %v662_v56 = vsub.f32 %v2441_v45, %v576_v55 }
 0x126   : > { %v738_v0 = vsel %vm674_vm2, %v663_v57, inf }
 0x127   : > { %v2086_v59 = vpop.f32.mrb[22].mxu0  ;;  %v735_v60 = vsel %vm674_vm2, %v662_v56, inf }
 0x128   : > { %733 = vmin.index.xlane.f32.xlu1 %v732_v58  ;;  %736 = vmin.index.xlane.f32.xlu0 %v735_v60  ;;  %v586_v61 = vpop.f32.mrb[23].mxu0  ;;  %v665_v63 = vsub.f32 %v2441_v45, %v2086_v59 }
 0x129   : > { %v664_v62 = vsub.f32 %v2441_v45, %v586_v61 }
 0x12a   : > { %v744_v6 = vsel %vm674_vm2, %v665_v63, inf }
 0x12b   : > { %v2089_v1 = vpop.f32.mrb[24].mxu0  ;;  %v741_v2 = vsel %vm674_vm2, %v664_v62, inf }
 0x12c   : > { %739 = vmin.index.xlane.f32.xlu1 %v738_v0  ;;  %742 = vmin.index.xlane.f32.xlu0 %v741_v2  ;;  %v596_v3 = vpop.f32.mrb[25].mxu0  ;;  %v667_v5 = vsub.f32 %v2441_v45, %v2089_v1 }
 0x12d   : > { %v666_v4 = vsub.f32 %v2441_v45, %v596_v3 }
 0x12e   : > { %v750_v13 = vsel %vm674_vm2, %v667_v5, inf }
 0x12f   : > { %v2092_v7 = vpop.f32.mrb[26].mxu0  ;;  %v747_v8 = vsel %vm674_vm2, %v666_v4, inf }
 0x130   : > { %745 = vmin.index.xlane.f32.xlu1 %v744_v6  ;;  %748 = vmin.index.xlane.f32.xlu0 %v747_v8  ;;  %v606_v9 = vpop.f32.mrb[27].mxu0  ;;  %v669_v12 = vsub.f32 %v2441_v45, %v2092_v7 }
 0x131   : > { %v668_v11 = vsub.f32 %v2441_v45, %v606_v9 }
 0x132   : > { %v756_v30 = vsel %vm674_vm2, %v669_v12, inf }
 0x133   : > { %v2095_v25 = vpop.f32.mrb[28].mxu0  ;;  %v753_v26 = vsel %vm674_vm2, %v668_v11, inf }
 0x134   : > { %751 = vmin.index.xlane.f32.xlu1 %v750_v13  ;;  %754 = vmin.index.xlane.f32.xlu0 %v753_v26  ;;  %v616_v27 = vpop.f32.mrb[29].mxu0  ;;  %v671_v29 = vsub.f32 %v2441_v45, %v2095_v25  ;;  %v1226_v13 = vadd.s32 4294967288, %v2508_v40 }
 0x135   : > { %v670_v28 = vsub.f32 %v2441_v45, %v616_v27  ;;  %v2618_v27 = vshrl.u32 %v771_v39, 7 }
 0x136   : > { %v762_v36 = vsel %vm674_vm2, %v671_v29, inf }
 0x137   : > { %v2098_v31 = vpop.f32.mrb[30].mxu0  ;;  %v759_v32 = vsel %vm674_vm2, %v670_v28, inf }
 0x138   : > { %757 = vmin.index.xlane.f32.xlu1 %v756_v30  ;;  %v673_v33 = vsub.f32 %v2441_v45, %v2098_v31  ;;  %760 = vmin.index.xlane.f32.xlu0 %v759_v32  ;;  %v626_v34 = vpop.f32.mrb[31].mxu0  ;;  %v2627_v30 = vsub.s32 %v1226_v13, %v2618_v27  ;;  %v1233_v31 = vadd.s32 4294967280, %v2508_v40  ;;  %v1240_v32 = vadd.s32 4294967272, %v2508_v40 }
 0x139   : > { %v672_v35 = vsub.f32 %v2441_v45, %v626_v34 }
 0x13a   : > { %v768_v38 = vsel %vm674_vm2, %v673_v33, inf  ;;  %v2650_v39 = vsub.s32 %v1233_v31, %v2618_v27 }
 0x13b   : > { %v765_v37 = vsel %vm674_vm2, %v672_v35, inf  ;;  %v2639_v35 = vsub.s32 %v2508_v40, %v2618_v27 }
 0x13c   : > { %763 = vmin.index.xlane.f32.xlu1 %v762_v36  ;;  %766 = vmin.index.xlane.f32.xlu0 %v765_v37 }
 0x140   : > { %769 = vmin.index.xlane.f32.xlu1 %v768_v38 }
 0x18d   : > { %v2510_v41 = vpop.xlane.xlu0 %676 }
 0x18e   : > { %vm773_vm3 = vcmp.eq.s32.totalorder %v2508_v40, %v2510_v41 }
 0x18f   : > { %v1888_v45 = vsel %vm773_vm3, 1.0, %v2240_v42 }
 0x190   : > { %2115 = vmatprep.mubr.msk.f32.mxu1 %vm674_vm2, %v1888_v45  ;;  %v2654_v45 = vsub.s32 %v1240_v32, %v2618_v27 }
 0x191   : > { %v2516_v43 = vpop.xlane.xlu0 %679  ;;  %v2518_v44 = vpop.xlane.xlu1 %682 }
 0x192   : > { %vm774_vm4 = vcmp.eq.s32.totalorder %v2508_v40, %v2516_v43  ;;  %vm775_vm5 = vcmp.eq.s32.totalorder %v2508_v40, %v2518_v44  ;;  %v1230_v38 = vrot.slane %v2516_v43, %v2627_v30  ;;  %v1225_v43 = vrot.slane %v2510_v41, %v2639_v35 }
 0x193   : > { %v1889_v46 = vsel %vm774_vm4, 1.0, %v2240_v42  ;;  %v1890_v47 = vsel %vm775_vm5, 1.0, %v2240_v42  ;;  %v1237_v41 = vrot.slane %v2518_v44, %v2650_v39 }
 0x194   : > { %2116 = vmatmul.mubr.msk.f32.vlgmr.msra.gmra.mrb[0].mxu1 %vm674_vm2, %v1889_v46 }
 0x195   : > { %2118 = vmatprep.mubr.msk.f32.mxu1 %vm674_vm2, %v1890_v47  ;;  %v2528_v48 = vpop.xlane.xlu1 %685  ;;  %v2530_v49 = vpop.xlane.xlu0 %688 }
 0x196   : > { %vm776_vm6 = vcmp.eq.s32.totalorder %v2508_v40, %v2528_v48  ;;  %vm777_vm7 = vcmp.eq.s32.totalorder %v2508_v40, %v2530_v49 }
 0x197   : > { %v1891_v50 = vsel %vm776_vm6, 1.0, %v2240_v42  ;;  %v1892_v51 = vsel %vm777_vm7, 1.0, %v2240_v42 }
 0x198   : > { %2119 = vmatmul.mubr.msk.f32.gmra.mrb[2].mxu1 %vm674_vm2, %v1891_v50 }
 0x199   : > { %v2539_v52 = vpop.xlane.xlu1 %691  ;;  %2121 = vmatprep.mubr.msk.f32.mxu1 %vm674_vm2, %v1892_v51  ;;  %v2542_v53 = vpop.xlane.xlu0 %694  ;;  %v1250_v51 = vrot.slane %v2530_v49, %v2639_v35  ;;  %v1244_v49 = vrot.slane %v2528_v48, %v2654_v45 }
 0x19a   : > { %vm778_vm8 = vcmp.eq.s32.totalorder %v2508_v40, %v2539_v52  ;;  %vm779_vm9 = vcmp.eq.s32.totalorder %v2508_v40, %v2542_v53  ;;  %v1254_v46 = vrot.slane %v2539_v52, %v2627_v30 }
 0x19b   : > { %v1893_v54 = vsel %vm778_vm8, 1.0, %v2240_v42  ;;  %v1894_v55 = vsel %vm779_vm9, 1.0, %v2240_v42 }
 0x19c   : > { %2122 = vmatmul.mubr.msk.f32.gmra.mrb[4].mxu1 %vm674_vm2, %v1893_v54 }
 0x19d   : > { %v2551_v56 = vpop.xlane.xlu1 %697  ;;  %2124 = vmatprep.mubr.msk.f32.mxu1 %vm674_vm2, %v1894_v55  ;;  %v2554_v57 = vpop.xlane.xlu0 %700 }
 0x19e   : > { %vm780_vm10 = vcmp.eq.s32.totalorder %v2508_v40, %v2551_v56  ;;  %vm781_vm11 = vcmp.eq.s32.totalorder %v2508_v40, %v2554_v57 }
 0x19f   : > { %v1895_v58 = vsel %vm780_vm10, 1.0, %v2240_v42  ;;  %v1896_v59 = vsel %vm781_vm11, 1.0, %v2240_v42  ;;  %vm1231_vm10 = vcmask 130112  }
 0x1a0   : > { %2125 = vmatmul.mubr.msk.f32.gmra.mrb[6].mxu1 %vm674_vm2, %v1895_v58  ;;  %v1232_v58 = vsel %vm1231_vm10, %v1230_v38, %v1225_v43 }
 0x1a1   : > { %v2563_v60 = vpop.xlane.xlu1 %703  ;;  %2127 = vmatprep.mubr.msk.f32.mxu1 %vm674_vm2, %v1896_v59  ;;  %v2566_v61 = vpop.xlane.xlu0 %706  ;;  %v1259_v59 = vrot.slane %v2542_v53, %v2650_v39 }
 0x1a2   : > { %vm782_vm12 = vcmp.eq.s32.totalorder %v2508_v40, %v2563_v60  ;;  %vm783_vm13 = vcmp.eq.s32.totalorder %v2508_v40, %v2566_v61  ;;  %v1273_v52 = vrot.slane %v2563_v60, %v2627_v30  ;;  %v1255_v60 = vsel %vm1231_vm10, %v1254_v46, %v1250_v51 }
 0x1a3   : > { %v1897_v62 = vsel %vm782_vm12, 1.0, %v2240_v42  ;;  %v1898_v63 = vsel %vm783_vm13, 1.0, %v2240_v42  ;;  %vm1238_vm13 = vcmask 195712   ;;  %v1278_v53 = vrot.slane %v2566_v61, %v2650_v39 }
 0x1a4   : > { %2128 = vmatmul.mubr.msk.f32.gmra.mrb[8].mxu1 %vm674_vm2, %v1897_v62  ;;  %v1264_v62 = vrot.slane %v2551_v56, %v2654_v45 }
 0x1a5   : > { %v2575_v0 = vpop.xlane.xlu1 %709  ;;  %2130 = vmatprep.mubr.msk.f32.mxu1 %vm674_vm2, %v1898_v63  ;;  %v2578_v1 = vpop.xlane.xlu0 %712  ;;  %v1269_v63 = vrot.slane %v2554_v57, %v2639_v35 }
 0x1a6   : > { %vm784_vm14 = vcmp.eq.s32.totalorder %v2508_v40, %v2575_v0  ;;  %vm785_vm15 = vcmp.eq.s32.totalorder %v2508_v40, %v2578_v1  ;;  %v1283_v61 = vrot.slane %v2575_v0, %v2654_v45 }
 0x1a7   : > { %v1899_v2 = vsel %vm784_vm14, 1.0, %v2240_v42  ;;  %v1900_v3 = vsel %vm785_vm15, 1.0, %v2240_v42  ;;  %vm1245_vm14 = vcmask 261312   ;;  %v1274_v48 = vsel %vm1231_vm10, %v1273_v52, %v1269_v63 }
 0x1a8   : > { %2131 = vmatmul.mubr.msk.f32.gmra.mrb[10].mxu1 %vm674_vm2, %v1899_v2  ;;  %v1279_v31 = vsel %vm1238_vm13, %v1278_v53, %v1274_v48 }
 0x1a9   : > { %v2587_v4 = vpop.xlane.xlu1 %715  ;;  %2133 = vmatprep.mubr.msk.f32.mxu1 %vm674_vm2, %v1900_v3  ;;  %v2590_v5 = vpop.xlane.xlu0 %718  ;;  %v1284_v38 = vsel %vm1245_vm14, %v1283_v61, %v1279_v31 }
 0x1aa   : > { %vm786_vm1 = vcmp.eq.s32.totalorder %v2508_v40, %v2587_v4  ;;  %vm787_vm3 = vcmp.eq.s32.totalorder %v2508_v40, %v2590_v5  ;;  %v1292_v56 = vrot.slane %v2587_v4, %v2627_v30  ;;  %v1288_v4 = vrot.slane %v2578_v1, %v2639_v35 }
 0x1ab   : > { %v1901_v6 = vsel %vm786_vm1, 1.0, %v2240_v42  ;;  %v1902_v7 = vsel %vm787_vm3, 1.0, %v2240_v42  ;;  %vm1380_vm3 = vcmask 1041409   ;;  %v1297_v0 = vrot.slane %v2590_v5, %v2650_v39 }
 0x1ac   : > { %2134 = vmatmul.mubr.msk.f32.gmra.mrb[12].mxu1 %vm674_vm2, %v1901_v6  ;;  %v1239_v6 = vsel %vm1238_vm13, %v1237_v41, %v1232_v58  ;;  %v1293_v1 = vsel %vm1231_vm10, %v1292_v56, %v1288_v4 }
 0x1ad   : > { %v2599_v8 = vpop.xlane.xlu1 %721  ;;  %2136 = vmatprep.mubr.msk.f32.mxu1 %vm674_vm2, %v1902_v7  ;;  %v2602_v9 = vpop.xlane.xlu0 %724  ;;  %v1260_v7 = vsel %vm1238_vm13, %v1259_v59, %v1255_v60 }
 0x1ae   : > { %vm788_vm4 = vcmp.eq.s32.totalorder %v2508_v40, %v2599_v8  ;;  %vm789_vm5 = vcmp.eq.s32.totalorder %v2508_v40, %v2602_v9 }
 0x1af   : > { %v1903_v11 = vsel %vm788_vm4, 1.0, %v2240_v42  ;;  %v1904_v12 = vsel %vm789_vm5, 1.0, %v2240_v42  ;;  %vm1382_vm4 = vcmask 1042434   ;;  %vm1384_vm5 = vcmask 1043459  }
 0x1b0   : > { %2137 = vmatmul.mubr.msk.f32.gmra.mrb[14].mxu1 %vm674_vm2, %v1903_v11  ;;  %v1246_v11 = vsel %vm1245_vm14, %v1244_v49, %v1239_v6 }
 0x1b1   : > { %v2612_v25 = vpop.xlane.xlu1 %727  ;;  %2139 = vmatprep.mubr.msk.f32.mxu1 %vm674_vm2, %v1904_v12  ;;  %v2615_v26 = vpop.xlane.xlu0 %730  ;;  %v1265_v12 = vsel %vm1245_vm14, %v1264_v62, %v1260_v7 }
 0x1b2   : > { %vm790_vm6 = vcmp.eq.s32.totalorder %v2508_v40, %v2612_v25  ;;  %vm791_vm7 = vcmp.eq.s32.totalorder %v2508_v40, %v2615_v26  ;;  %v1311_v13 = vrot.slane %v2612_v25, %v2627_v30  ;;  %v1307_v25 = vrot.slane %v2602_v9, %v2639_v35 }
 0x1b3   : > { %v1905_v28 = vsel %vm790_vm6, 1.0, %v2240_v42  ;;  %v1906_v29 = vsel %vm791_vm7, 1.0, %v2240_v42  ;;  %v1316_v5 = vrot.slane %v2615_v26, %v2650_v39  ;;  %v1302_v9 = vrot.slane %v2599_v8, %v2654_v45 }
 0x1b4   : > { %2140 = vmatmul.mubr.msk.f32.gmra.mrb[16].mxu1 %vm674_vm2, %v1905_v28  ;;  %v1312_v43 = vsel %vm1231_vm10, %v1311_v13, %v1307_v25 }
 0x1b5   : > { %v2632_v33 = vpop.xlane.xlu1 %733  ;;  %2142 = vmatprep.mubr.msk.f32.mxu1 %vm674_vm2, %v1906_v29  ;;  %v2635_v34 = vpop.xlane.xlu0 %736  ;;  %v1317_v59 = vsel %vm1238_vm13, %v1316_v5, %v1312_v43 }
 0x1b6   : > { %vm792_vm8 = vcmp.eq.s32.totalorder %v2508_v40, %v2632_v33  ;;  %vm793_vm9 = vcmp.eq.s32.totalorder %v2508_v40, %v2635_v34  ;;  %v1321_v51 = vrot.slane %v2632_v33, %v2654_v45 }
 0x1b7   : > { %v1907_v36 = vsel %vm792_vm8, 1.0, %v2240_v42  ;;  %v1908_v37 = vsel %vm793_vm9, 1.0, %v2240_v42  ;;  %vm1386_vm8 = vcmask 1044484   ;;  %vm1388_vm9 = vcmask 1045509  }
 0x1b8   : > { %2143 = vmatmul.mubr.msk.f32.gmra.mrb[18].mxu1 %vm674_vm2, %v1907_v36  ;;  %v1322_v62 = vsel %vm1245_vm14, %v1321_v51, %v1317_v59 }
 0x1b9   : > { %v2658_v47 = vpop.xlane.xlu1 %739  ;;  %2145 = vmatprep.mubr.msk.f32.mxu1 %vm674_vm2, %v1908_v37  ;;  %v2661_v50 = vpop.xlane.xlu0 %742  ;;  %v1381_v37 = vsel %vm1380_vm3, %v1265_v12, %v1246_v11  ;;  %vm1390_vm3 = vcmask 1046534  }
 0x1ba   : > { %vm794_vm11 = vcmp.eq.s32.totalorder %v2508_v40, %v2658_v47  ;;  %vm795_vm12 = vcmp.eq.s32.totalorder %v2508_v40, %v2661_v50  ;;  %v1330_v46 = vrot.slane %v2658_v47, %v2627_v30  ;;  %v1298_v47 = vsel %vm1238_vm13, %v1297_v0, %v1293_v1 }
 0x1bb   : > { %v1909_v54 = vsel %vm794_vm11, 1.0, %v2240_v42  ;;  %v1910_v55 = vsel %vm795_vm12, 1.0, %v2240_v42  ;;  %v1335_v8 = vrot.slane %v2661_v50, %v2650_v39  ;;  %v1303_v50 = vsel %vm1245_vm14, %v1302_v9, %v1298_v47 }
 0x1bc   : > { %2146 = vmatmul.mubr.msk.f32.gmra.mrb[20].mxu1 %vm674_vm2, %v1909_v54  ;;  %v1383_v61 = vsel %vm1382_vm4, %v1284_v38, %v1381_v37  ;;  %vm1392_vm4 = vcmask 1047559   ;;  %v1399_v38 = vadd.s32 16, %v2618_v27 }
 0x1bd   : > { %v2688_v2 = vpop.xlane.xlu1 %745  ;;  %2148 = vmatprep.mubr.msk.f32.mxu1 %vm674_vm2, %v1910_v55  ;;  %v2691_v44 = vpop.xlane.xlu0 %748  ;;  %v1326_v55 = vrot.slane %v2635_v34, %v2639_v35 }
 0x1be   : > { %vm796_vm15 = vcmp.eq.s32.totalorder %v2508_v40, %v2688_v2  ;;  %vm797_vm1 = vcmp.eq.s32.totalorder %v2508_v40, %v2691_v44  ;;  %v1345_v33 = vrot.slane %v2691_v44, %v2639_v35  ;;  %v1340_v34 = vrot.slane %v2688_v2, %v2654_v45 }
 0x1bf   : > { %v1911_v57 = vsel %vm796_vm15, 1.0, %v2240_v42  ;;  %v1912_v3 = vsel %vm797_vm1, 1.0, %v2240_v42  ;;  %v1331_v49 = vsel %vm1231_vm10, %v1330_v46, %v1326_v55  ;;  %v1402_v46 = vadd.s32 40, %v2618_v27 }
 0x1c0   : > { %2149 = vmatmul.mubr.msk.f32.gmra.mrb[22].mxu1 %vm674_vm2, %v1911_v57  ;;  %v1336_v57 = vsel %vm1238_vm13, %v1335_v8, %v1331_v49 }
 0x1c1   : > { %v752_v28 = vpop.xlane.xlu1 %751  ;;  %2151 = vmatprep.mubr.msk.f32.mxu1 %vm674_vm2, %v1912_v3  ;;  %v755_v29 = vpop.xlane.xlu0 %754  ;;  %v1341_v11 = vsel %vm1245_vm14, %v1340_v34, %v1336_v57 }
 0x1c2   : > { %vm798_vm6 = vcmp.eq.s32.totalorder %v2508_v40, %v752_v28  ;;  %vm799_vm7 = vcmp.eq.s32.totalorder %v2508_v40, %v755_v29  ;;  %v1349_v52 = vrot.slane %v752_v28, %v2627_v30  ;;  %v1354_v60 = vrot.slane %v755_v29, %v2650_v39 }
 0x1c3   : > { %v1913_v32 = vsel %vm798_vm6, 1.0, %v2240_v42  ;;  %v1914_v36 = vsel %vm799_vm7, 1.0, %v2240_v42 }
 0x1c4   : > { %2152 = vmatmul.mubr.msk.f32.gmra.mrb[24].mxu1 %vm674_vm2, %v1913_v32  ;;  %v1350_v63 = vsel %vm1231_vm10, %v1349_v52, %v1345_v33  ;;  %v2801_v32 = vstv %s1952_s25 }
 0x1c5   : > { %v758_v54 = vpop.xlane.xlu1 %757  ;;  %2154 = vmatprep.mubr.msk.f32.mxu1 %vm674_vm2, %v1914_v36  ;;  %v761_v26 = vpop.xlane.xlu0 %760  ;;  %v1400_v36 = vadd.s32 24, %v2618_v27  ;;  %v1432_v52 = vadd.s32 %v2801_v32, %v1399_v38  ;;  %v1435_v55 = vadd.s32 %v2801_v32, %v1402_v46  ;;  %v1410_v46 = vadd.s32 104, %v2618_v27 }
 0x1c6   : > { %vm800_vm11 = vcmp.eq.s32.totalorder %v2508_v40, %v758_v54  ;;  %vm801_vm12 = vcmp.eq.s32.totalorder %v2508_v40, %v761_v26  ;;  %v1359_v44 = vrot.slane %v758_v54, %v2654_v45  ;;  %v1364_v48 = vrot.slane %v761_v26, %v2639_v35 }
 0x1c7   : > { %v1915_v58 = vsel %vm800_vm11, 1.0, %v2240_v42  ;;  %v1916_v41 = vsel %vm801_vm12, 1.0, %v2240_v42  ;;  %v1355_v35 = vsel %vm1238_vm13, %v1354_v60, %v1350_v63  ;;  %v1433_v5 = vadd.s32 %v2801_v32, %v1400_v36 }
 0x1c8   : > { %2155 = vmatmul.mubr.msk.f32.gmra.mrb[26].mxu1 %vm674_vm2, %v1915_v58  ;;  %v1360_v4 = vsel %vm1245_vm14, %v1359_v44, %v1355_v35  ;;  %v1401_v54 = vadd.s32 32, %v2618_v27  ;;  %v1405_v63 = vadd.s32 64, %v2618_v27 }
 0x1c9   : > { %v764_v53 = vpop.xlane.xlu1 %763  ;;  %2157 = vmatprep.mubr.msk.f32.mxu1 %vm674_vm2, %v1916_v41  ;;  %v767_v2 = vpop.xlane.xlu0 %766  ;;  %v1403_v41 = vadd.s32 48, %v2618_v27 }
 0x1ca   : > { %vm802_vm15 = vcmp.eq.s32.totalorder %v2508_v40, %v764_v53  ;;  %v1368_v56 = vrot.slane %v764_v53, %v2627_v30  ;;  %vm803_vm1 = vcmp.eq.s32.totalorder %v2508_v40, %v767_v2  ;;  %v1373_v7 = vrot.slane %v767_v2, %v2650_v39 }
 0x1cb   : > { %v1917_v3 = vsel %vm802_vm15, 1.0, %v2240_v42  ;;  %v1918_v6 = vsel %vm803_vm1, 1.0, %v2240_v42  ;;  %v1385_v30 = vsel %vm1384_vm5, %v1303_v50, %v1383_v61  ;;  %vm1467_vm5 = vcmp.lt.s32.totalorder %v1435_v55, 512 }
 0x1cc   : > { %v1369_v12 = vsel %vm1231_vm10, %v1368_v56, %v1364_v48  ;;  %2158 = vmatmul.mubr.msk.f32.gmra.mrb[28].mxu1 %vm674_vm2, %v1917_v3  ;;  %v1387_v39 = vsel %vm1386_vm8, %v1322_v62, %v1385_v30  ;;  %v1406_v62 = vadd.s32 72, %v2618_v27  ;;  %v1436_v57 = vadd.s32 %v2801_v32, %v1403_v41 }
 0x1cd   : > { %v770_v13 = vpop.xlane.xlu1 %769  ;;  %2160 = vmatprep.mubr.msk.f32.mxu1 %vm674_vm2, %v1918_v6  ;;  %v1389_v29 = vsel %vm1388_vm9, %v1341_v11, %v1387_v39  ;;  %v1374_v31 = vsel %vm1238_vm13, %v1373_v7, %v1369_v12  ;;  %vm1465_vm13 = vcmp.lt.s32.totalorder %v1433_v5, 512  ;;  %v1438_v35 = vadd.s32 %v2801_v32, %v1405_v63 }
 0x1ce   : > { %vm804_vm6 = vcmp.eq.s32.totalorder %v2508_v40, %v770_v13  ;;  %v1378_v28 = vrot.slane %v770_v13, %v2654_v45  ;;  %v1391_v1 = vsel %vm1390_vm3, %v1360_v4, %v1389_v29  ;;  %v1398_v45 = vadd.s32 8, %v2618_v27 }
 0x1cf   : > { %v1919_v0 = vsel %vm804_vm6, 1.0, %v2240_v42  ;;  %v1430_v42 = vadd.s32 %v2801_v32, %v2618_v27  ;;  %v1439_v11 = vadd.s32 %v2801_v32, %v1406_v62  ;;  %v1408_v4 = vadd.s32 88, %v2618_v27 }
 0x1d0   : > { %v1379_v25 = vsel %vm1245_vm14, %v1378_v28, %v1374_v31  ;;  %2161 = vmatmul.mubr.msk.f32.gmra.mrb[30].mxu1 %vm674_vm2, %v1919_v0  ;;  %v1431_v37 = vadd.s32 %v2801_v32, %v1398_v45  ;;  %vm1464_vm14 = vcmp.lt.s32.totalorder %v1432_v52, 512  ;;  %vm1468_vm9 = vcmp.lt.s32.totalorder %v1436_v57, 512 }
 0x1d1   : > { %v1393_v40 = vsel %vm1392_vm4, %v1379_v25, %v1391_v1  ;;  %vm1462_vm10 = vcmp.lt.s32.totalorder %v1430_v42, 512  ;;  %vm1471_vm11 = vcmp.lt.s32.totalorder %v1439_v11, 512  ;;  %vm1470_vm12 = vcmp.lt.s32.totalorder %v1438_v35, 512 }
 0x1d2   : > { %1394 = vst.msk [vmem:[%s244_s24] sm:$0xff] %vm289_vm0, %v1393_v40  ;;  %vm1463_vm2 = vcmp.lt.s32.totalorder %v1431_v37, 512  ;;  %v1441_v37 = vadd.s32 %v2801_v32, %v1408_v4  ;;  %v1412_v55 = vadd.s32 120, %v2618_v27 }
 0x1d4   : > { %vm1473_vm15 = vcmp.lt.s32.totalorder %v1441_v37, 512 }
 0x267   : > { %v2117_v9 = vpop.f32.mrb[0].mxu1 }
 0x268   : > { %1191 = vst.msk [vmem:[%s2813_s29 + $0x8] sm:$0xff] %vm289_vm0, %v2117_v9  ;;  %v1495_v43 = vsub.f32 %v2117_v9, %v2344_v14  ;;  %v1031_v51 = vpop.f32.mrb[1].mxu1  ;;  %v1404_v14 = vadd.s32 56, %v2618_v27  ;;  %v1409_v9 = vadd.s32 96, %v2618_v27 }
 0x269   : > { %1190 = vst.msk [vmem:[%s2813_s29] sm:$0xff] %vm289_vm0, %v1031_v51  ;;  %v1494_v26 = vsub.f32 %v1031_v51, %v2323_v10  ;;  %v1434_v10 = vadd.s32 %v2801_v32, %v1401_v54 }
 0x26a   : > { %v1591_v47 = vsel %vm1463_vm2, %v1495_v43, 0.0  ;;  %v1437_v56 = vadd.s32 %v2801_v32, %v1404_v14 }
 0x26b   : > { %v1623_v8 = vmul.f32 %v1591_v47, %v1591_v47  ;;  %v1590_v33 = vsel %vm1462_vm10, %v1494_v26, 0.0  ;;  %v2120_v58 = vpop.f32.mrb[2].mxu1  ;;  %vm1466_vm7 = vcmp.lt.s32.totalorder %v1434_v10, 512 }
 0x26c   : > { %v1622_v59 = vmul.f32 %v1590_v33, %v1590_v33  ;;  %1193 = vst.msk [vmem:[%s2813_s29 + $0x18] sm:$0xff] %vm289_vm0, %v2120_v58  ;;  %v1497_v49 = vsub.f32 %v2120_v58, %v2354_v16  ;;  %v1041_v34 = vpop.f32.mrb[3].mxu1  ;;  %vm1469_vm8 = vcmp.lt.s32.totalorder %v1437_v56, 512 }
 0x26d   : > { %v1655_v60 = vsel %vm289_vm0, %v1623_v8, 0.0  ;;  %1192 = vst.msk [vmem:[%s2813_s29 + $0x10] sm:$0xff] %vm289_vm0, %v1041_v34  ;;  %v1496_v50 = vsub.f32 %v1041_v34, %v2347_v15  ;;  %v1411_v8 = vadd.s32 112, %v2618_v27 }
 0x26e   : > { %v1654_v44 = vsel %vm289_vm0, %v1622_v59, 0.0  ;;  %v1593_v16 = vsel %vm1465_vm13, %v1497_v49, 0.0  ;;  %v1443_v59 = vadd.s32 %v2801_v32, %v1410_v46  ;;  %v1442_v49 = vadd.s32 %v2801_v32, %v1409_v9 }
 0x26f   : > { %v1656_v53 = vadd.f32 %v1655_v60, %v1654_v44  ;;  %v1592_v2 = vsel %vm1464_vm14, %v1496_v50, 0.0  ;;  %v2123_v48 = vpop.f32.mrb[4].mxu1  ;;  %v1625_v3 = vmul.f32 %v1593_v16, %v1593_v16  ;;  %v1445_v44 = vadd.s32 %v2801_v32, %v1412_v55 }
 0x270   : > { %v1624_v6 = vmul.f32 %v1592_v2, %v1592_v2  ;;  %1195 = vst.msk [vmem:[%s2813_s29 + $0x28] sm:$0xff] %vm289_vm0, %v2123_v48  ;;  %v1499_v15 = vsub.f32 %v2123_v48, %v2364_v18  ;;  %v1051_v7 = vpop.f32.mrb[5].mxu1  ;;  %v1407_v18 = vadd.s32 80, %v2618_v27  ;;  %v1444_v16 = vadd.s32 %v2801_v32, %v1411_v8 }
 0x271   : > { %1194 = vst.msk [vmem:[%s2813_s29 + $0x20] sm:$0xff] %vm289_vm0, %v1051_v7  ;;  %v1498_v61 = vsub.f32 %v1051_v7, %v2357_v17  ;;  %v1659_v17 = vsel %vm289_vm0, %v1625_v3, 0.0  ;;  %v1414_v48 = vadd.s32 136, %v2618_v27  ;;  %vm1475_vm3 = vcmp.lt.s32.totalorder %v1443_v59, 512  ;;  %v2212_v7 = vld [vmem:[%s2320_s11 + $0x68] sm:$0xff] }
 0x272   : > { %v1657_v12 = vsel %vm289_vm0, %v1624_v6, 0.0  ;;  %v1595_v30 = vsel %vm1467_vm5, %v1499_v15, 0.0  ;;  %v1440_v42 = vadd.s32 %v2801_v32, %v1407_v18  ;;  %vm1474_vm4 = vcmp.lt.s32.totalorder %v1442_v49, 512 }
 0x273   : > { %v1658_v13 = vadd.f32 %v1657_v12, %v1656_v53  ;;  %v1594_v39 = vsel %vm1466_vm7, %v1498_v61, 0.0  ;;  %v2126_v28 = vpop.f32.mrb[6].mxu1  ;;  %v1627_v29 = vmul.f32 %v1595_v30, %v1595_v30  ;;  %v2213_v12 = vld [vmem:[%s2320_s11 + $0x60] sm:$0xff]  ;;  %vm1477_vm6 = vcmp.lt.s32.totalorder %v1445_v44, 512 }
 0x274   : > { %v1626_v31 = vmul.f32 %v1594_v39, %v1594_v39  ;;  %1197 = vst.msk [vmem:[%s2813_s29 + $0x38] sm:$0xff] %vm289_vm0, %v2126_v28  ;;  %v1501_v0 = vsub.f32 %v2126_v28, %v2374_v20  ;;  %v1061_v1 = vpop.f32.mrb[7].mxu1  ;;  %vm1472_vm1 = vcmp.lt.s32.totalorder %v1440_v42, 512  ;;  %vm1476_vm2 = vcmp.lt.s32.totalorder %v1444_v16, 512 }
 0x275   : > { %v1660_v25 = vadd.f32 %v1659_v17, %v1658_v13  ;;  %1196 = vst.msk [vmem:[%s2813_s29 + $0x30] sm:$0xff] %vm289_vm0, %v1061_v1  ;;  %v1500_v40 = vsub.f32 %v1061_v1, %v2367_v19  ;;  %v1663_v19 = vsel %vm289_vm0, %v1627_v29, 0.0  ;;  %v1447_v13 = vadd.s32 %v2801_v32, %v1414_v48  ;;  %v2218_v48 = vld [vmem:[%s2320_s11 + $0x98] sm:$0xff] }
 0x276   : > { %v1661_v45 = vsel %vm289_vm0, %v1626_v31, 0.0  ;;  %v1597_v36 = vsel %vm1469_vm8, %v1501_v0, 0.0  ;;  %v1416_v31 = vadd.s32 152, %v2618_v27  ;;  %v1415_v0 = vadd.s32 144, %v2618_v27 }
 0x277   : > { %v1662_v38 = vadd.f32 %v1661_v45, %v1660_v25  ;;  %v1596_v20 = vsel %vm1468_vm9, %v1500_v40, 0.0  ;;  %v2129_v5 = vpop.f32.mrb[8].mxu1  ;;  %v1629_v43 = vmul.f32 %v1597_v36, %v1597_v36  ;;  %v2214_v45 = vld [vmem:[%s2320_s11 + $0x78] sm:$0xff]  ;;  %v1417_v46 = vadd.s32 160, %v2618_v27 }
 0x278   : > { %v1628_v51 = vmul.f32 %v1596_v20, %v1596_v20  ;;  %1199 = vst.msk [vmem:[%s2813_s29 + $0x48] sm:$0xff] %vm289_vm0, %v2129_v5  ;;  %v1503_v52 = vsub.f32 %v2129_v5, %v2384_v22  ;;  %v1071_v54 = vpop.f32.mrb[9].mxu1  ;;  %v1418_v5 = vadd.s32 168, %v2618_v27  ;;  %vm1479_vm10 = vcmp.lt.s32.totalorder %v1447_v13, 512 }
 0x279   : > { %v1664_v26 = vadd.f32 %v1663_v19, %v1662_v38  ;;  %1198 = vst.msk [vmem:[%s2813_s29 + $0x40] sm:$0xff] %vm289_vm0, %v1071_v54  ;;  %v1502_v47 = vsub.f32 %v1071_v54, %v2377_v21  ;;  %v1667_v21 = vsel %vm289_vm0, %v1629_v43, 0.0  ;;  %v2215_v38 = vld [vmem:[%s2320_s11 + $0x70] sm:$0xff]  ;;  %v1449_v54 = vadd.s32 %v2801_v32, %v1416_v31 }
 0x27a   : > { %v1665_v33 = vsel %vm289_vm0, %v1628_v51, 0.0  ;;  %v1599_v58 = vsel %vm1471_vm11, %v1503_v52, 0.0  ;;  %v1451_v49 = vadd.s32 %v2801_v32, %v1418_v5 }
 0x27b   : > { %v1666_v14 = vadd.f32 %v1665_v33, %v1664_v26  ;;  %v1598_v22 = vsel %vm1470_vm12, %v1502_v47, 0.0  ;;  %v2132_v41 = vpop.f32.mrb[10].mxu1  ;;  %v1631_v34 = vmul.f32 %v1599_v58, %v1599_v58  ;;  %v1448_v26 = vadd.s32 %v2801_v32, %v1415_v0  ;;  %v2216_v33 = vld [vmem:[%s2320_s11 + $0x88] sm:$0xff]  ;;  %v2221_v0 = vld [vmem:[%s2320_s11 + $0xa0] sm:$0xff] }
 0x27c   : > { %v1630_v10 = vmul.f32 %v1598_v22, %v1598_v22  ;;  %1201 = vst.msk [vmem:[%s2813_s29 + $0x58] sm:$0xff] %vm289_vm0, %v2132_v41  ;;  %v1505_v60 = vsub.f32 %v2132_v41, %v2394_v24  ;;  %v1081_v50 = vpop.f32.mrb[11].mxu1  ;;  %v1413_v24 = vadd.s32 128, %v2618_v27  ;;  %v2217_v41 = vld [vmem:[%s2320_s11 + $0x80] sm:$0xff]  ;;  %vm1481_vm14 = vcmp.lt.s32.totalorder %v1449_v54, 512 }
 0x27d   : > { %v1668_v62 = vadd.f32 %v1667_v21, %v1666_v14  ;;  %1200 = vst.msk [vmem:[%s2813_s29 + $0x50] sm:$0xff] %vm289_vm0, %v1081_v50  ;;  %v1504_v63 = vsub.f32 %v1081_v50, %v2387_v23  ;;  %v1671_v23 = vsel %vm289_vm0, %v1631_v34, 0.0  ;;  %v1450_v21 = vadd.s32 %v2801_v32, %v1417_v46 }
 0x27e   : > { %v1669_v53 = vsel %vm289_vm0, %v1630_v10, 0.0  ;;  %v1601_v2 = vsel %vm1473_vm15, %v1505_v60, 0.0  ;;  %v1446_v39 = vadd.s32 %v2801_v32, %v1413_v24  ;;  %v1420_v60 = vadd.s32 184, %v2618_v27 }
 0x27f   : > { %v1670_v56 = vadd.f32 %v1669_v53, %v1668_v62  ;;  %v1600_v57 = vsel %vm1472_vm1, %v1504_v63, 0.0  ;;  %v2135_v3 = vpop.f32.mrb[12].mxu1  ;;  %v1633_v6 = vmul.f32 %v1601_v2, %v1601_v2  ;;  %v1419_v50 = vadd.s32 176, %v2618_v27 }
 0x280   : > { %v1632_v15 = vmul.f32 %v1600_v57, %v1600_v57  ;;  %1203 = vst.msk [vmem:[%s2813_s29 + $0x68] sm:$0xff] %vm289_vm0, %v2135_v3  ;;  %v1507_v61 = vsub.f32 %v2135_v3, %v2212_v7  ;;  %v1091_v11 = vpop.f32.mrb[13].mxu1  ;;  %vm1478_vm13 = vcmp.lt.s32.totalorder %v1446_v39, 512  ;;  %vm1480_vm5 = vcmp.lt.s32.totalorder %v1448_v26, 512  ;;  %v2219_v3 = vld [vmem:[%s2320_s11 + $0x90] sm:$0xff] }
 0x281   : > { %v1672_v35 = vadd.f32 %v1671_v23, %v1670_v56  ;;  %1202 = vst.msk [vmem:[%s2813_s29 + $0x60] sm:$0xff] %vm289_vm0, %v1091_v11  ;;  %v1506_v30 = vsub.f32 %v1091_v11, %v2213_v12  ;;  %v1675_v1 = vsel %vm289_vm0, %v1633_v6, 0.0  ;;  %vm1483_vm7 = vcmp.lt.s32.totalorder %v1451_v49, 512  ;;  %v2223_v26 = vld [vmem:[%s2320_s11 + $0xb0] sm:$0xff] }
 0x282   : > { %v1673_v4 = vsel %vm289_vm0, %v1632_v15, 0.0  ;;  %v1603_v18 = vsel %vm1475_vm3, %v1507_v61, 0.0  ;;  %vm1482_vm8 = vcmp.lt.s32.totalorder %v1450_v21, 512  ;;  %v1453_v7 = vadd.s32 %v2801_v32, %v1420_v60  ;;  %v2224_v60 = vld [vmem:[%s2320_s11 + $0xc8] sm:$0xff] }
 0x283   : > { %v1674_v28 = vadd.f32 %v1673_v4, %v1672_v35  ;;  %v1602_v17 = vsel %vm1474_vm4, %v1506_v30, 0.0  ;;  %v2138_v29 = vpop.f32.mrb[14].mxu1  ;;  %v1635_v25 = vmul.f32 %v1603_v18, %v1603_v18  ;;  %v1452_v61 = vadd.s32 %v2801_v32, %v1419_v50 }
 0x284   : > { %v1634_v40 = vmul.f32 %v1602_v17, %v1602_v17  ;;  %1205 = vst.msk [vmem:[%s2813_s29 + $0x78] sm:$0xff] %vm289_vm0, %v2138_v29  ;;  %v1509_v36 = vsub.f32 %v2138_v29, %v2214_v45  ;;  %v1101_v37 = vpop.f32.mrb[15].mxu1  ;;  %v1422_v30 = vadd.s32 200, %v2618_v27  ;;  %v1421_v4 = vadd.s32 192, %v2618_v27 }
 0x285   : > { %v1676_v42 = vadd.f32 %v1675_v1, %v1674_v28  ;;  %1204 = vst.msk [vmem:[%s2813_s29 + $0x70] sm:$0xff] %vm289_vm0, %v1101_v37  ;;  %v1508_v20 = vsub.f32 %v1101_v37, %v2215_v38  ;;  %v1679_v47 = vsel %vm289_vm0, %v1635_v25, 0.0  ;;  %v2220_v28 = vld [vmem:[%s2320_s11 + $0xa8] sm:$0xff]  ;;  %v1424_v25 = vadd.s32 216, %v2618_v27 }
 0x286   : > { %v1677_v9 = vsel %vm289_vm0, %v1634_v40, 0.0  ;;  %v1605_v19 = vsel %vm1477_vm6, %v1509_v36, 0.0  ;;  %v1423_v40 = vadd.s32 208, %v2618_v27  ;;  %vm1485_vm9 = vcmp.lt.s32.totalorder %v1453_v7, 512 }
 0x287   : > { %v1678_v43 = vadd.f32 %v1677_v9, %v1676_v42  ;;  %v1604_v51 = vsel %vm1476_vm2, %v1508_v20, 0.0  ;;  %v2141_v52 = vpop.f32.mrb[16].mxu1  ;;  %v1637_v55 = vmul.f32 %v1605_v19, %v1605_v19  ;;  %vm1484_vm11 = vcmp.lt.s32.totalorder %v1452_v61, 512 }
 0x288   : > { %v1636_v8 = vmul.f32 %v1604_v51, %v1604_v51  ;;  %1207 = vst.msk [vmem:[%s2813_s29 + $0x88] sm:$0xff] %vm289_vm0, %v2141_v52  ;;  %v1511_v58 = vsub.f32 %v2141_v52, %v2216_v33  ;;  %v1111_v14 = vpop.f32.mrb[17].mxu1  ;;  %v1455_v20 = vadd.s32 %v2801_v32, %v1422_v30  ;;  %v1454_v5 = vadd.s32 %v2801_v32, %v1421_v4  ;;  %v2227_v4 = vld [vmem:[%s2320_s11 + $0xd0] sm:$0xff] }
 0x289   : > { %v1680_v22 = vadd.f32 %v1679_v47, %v1678_v43  ;;  %1206 = vst.msk [vmem:[%s2813_s29 + $0x80] sm:$0xff] %vm289_vm0, %v1111_v14  ;;  %v1510_v59 = vsub.f32 %v1111_v14, %v2217_v41  ;;  %v1683_v16 = vsel %vm289_vm0, %v1637_v55, 0.0  ;;  %v2222_v43 = vld [vmem:[%s2320_s11 + $0xb8] sm:$0xff]  ;;  %v1457_v55 = vadd.s32 %v2801_v32, %v1424_v25 }
 0x28a   : > { %v1681_v34 = vsel %vm289_vm0, %v1636_v8, 0.0  ;;  %v1607_v10 = vsel %vm1479_vm10, %v1511_v58, 0.0  ;;  %v1456_v8 = vadd.s32 %v2801_v32, %v1423_v40  ;;  %v1426_v14 = vadd.s32 232, %v2618_v27  ;;  %v2228_v40 = vld [vmem:[%s2320_s11 + $0xe8] sm:$0xff] }
 0x28b   : > { %v1682_v62 = vadd.f32 %v1681_v34, %v1680_v22  ;;  %v1606_v63 = vsel %vm1478_vm13, %v1510_v59, 0.0  ;;  %v2144_v44 = vpop.f32.mrb[18].mxu1  ;;  %v1639_v53 = vmul.f32 %v1607_v10, %v1607_v10  ;;  %v1425_v22 = vadd.s32 224, %v2618_v27 }
 0x28c   : > { %v1638_v2 = vmul.f32 %v1606_v63, %v1606_v63  ;;  %1209 = vst.msk [vmem:[%s2813_s29 + $0x98] sm:$0xff] %vm289_vm0, %v2144_v44  ;;  %v1513_v24 = vsub.f32 %v2144_v44, %v2218_v48  ;;  %v1121_v56 = vpop.f32.mrb[19].mxu1  ;;  %vm1487_vm12 = vcmp.lt.s32.totalorder %v1455_v20, 512  ;;  %vm1486_vm15 = vcmp.lt.s32.totalorder %v1454_v5, 512  ;;  %v2225_v44 = vld [vmem:[%s2320_s11 + $0xc0] sm:$0xff] }
 0x28d   : > { %v1684_v57 = vadd.f32 %v1683_v16, %v1682_v62  ;;  %1208 = vst.msk [vmem:[%s2813_s29 + $0x90] sm:$0xff] %vm289_vm0, %v1121_v56  ;;  %v1512_v23 = vsub.f32 %v1121_v56, %v2219_v3  ;;  %v1687_v18 = vsel %vm289_vm0, %v1639_v53, 0.0  ;;  %vm1489_vm1 = vcmp.lt.s32.totalorder %v1457_v55, 512  ;;  %v2231_v55 = vld [vmem:[%s2320_s11 + $0xf0] sm:$0xff] }
 0x28e   : > { %v1685_v6 = vsel %vm289_vm0, %v1638_v2, 0.0  ;;  %v1609_v15 = vsel %vm1481_vm14, %v1513_v24, 0.0  ;;  %vm1488_vm3 = vcmp.lt.s32.totalorder %v1456_v8, 512  ;;  %v1459_v48 = vadd.s32 %v2801_v32, %v1426_v14 }
 0x28f   : > { %v1686_v11 = vadd.f32 %v1685_v6, %v1684_v57  ;;  %v1608_v35 = vsel %vm1480_vm5, %v1512_v23, 0.0  ;;  %v2147_v12 = vpop.f32.mrb[20].mxu1  ;;  %v1641_v13 = vmul.f32 %v1609_v15, %v1609_v15  ;;  %v1458_v24 = vadd.s32 %v2801_v32, %v1425_v22 }
 0x290   : > { %v1640_v39 = vmul.f32 %v1608_v35, %v1608_v35  ;;  %1211 = vst.msk [vmem:[%s2813_s29 + $0xa8] sm:$0xff] %vm289_vm0, %v2147_v12  ;;  %v1515_v17 = vsub.f32 %v2147_v12, %v2220_v28  ;;  %v1131_v29 = vpop.f32.mrb[21].mxu1  ;;  %v1428_v23 = vadd.s32 248, %v2618_v27  ;;  %v1427_v6 = vadd.s32 240, %v2618_v27 }
 0x291   : > { %v1688_v31 = vadd.f32 %v1687_v18, %v1686_v11  ;;  %1210 = vst.msk [vmem:[%s2813_s29 + $0xa0] sm:$0xff] %vm289_vm0, %v1131_v29  ;;  %v1514_v1 = vsub.f32 %v1131_v29, %v2221_v0  ;;  %v1691_v46 = vsel %vm289_vm0, %v1641_v13, 0.0  ;;  %v2226_v11 = vld [vmem:[%s2320_s11 + $0xd8] sm:$0xff]  ;;  %vm1491_vm4 = vcmp.lt.s32.totalorder %v1459_v48, 512 }
 0x292   : > { %v1689_v45 = vsel %vm289_vm0, %v1640_v39, 0.0  ;;  %v1611_v36 = vsel %vm1483_vm7, %v1515_v17, 0.0  ;;  %vm1490_vm6 = vcmp.lt.s32.totalorder %v1458_v24, 512  ;;  %v1461_v29 = vadd.s32 %v2801_v32, %v1428_v23 }
 0x293   : > { %v1690_v37 = vadd.f32 %v1689_v45, %v1688_v31  ;;  %v1610_v42 = vsel %vm1482_vm8, %v1514_v1, 0.0  ;;  %v2150_v38 = vpop.f32.mrb[22].mxu1  ;;  %v1643_v9 = vmul.f32 %v1611_v36, %v1611_v36  ;;  %v1460_v31 = vadd.s32 %v2801_v32, %v1427_v6 }
 0x294   : > { %v1642_v19 = vmul.f32 %v1610_v42, %v1610_v42  ;;  %1213 = vst.msk [vmem:[%s2813_s29 + $0xb8] sm:$0xff] %vm289_vm0, %v2150_v38  ;;  %v1517_v51 = vsub.f32 %v2150_v38, %v2222_v43  ;;  %v1141_v52 = vpop.f32.mrb[23].mxu1  ;;  %v2229_v42 = vld [vmem:[%s2320_s11 + $0xe0] sm:$0xff]  ;;  %vm1493_vm2 = vcmp.lt.s32.totalorder %v1461_v29, 512 }
 0x295   : > { %v1692_v54 = vadd.f32 %v1691_v46, %v1690_v37  ;;  %1212 = vst.msk [vmem:[%s2813_s29 + $0xb0] sm:$0xff] %vm289_vm0, %v1141_v52  ;;  %v1516_v47 = vsub.f32 %v1141_v52, %v2223_v26  ;;  %v1695_v21 = vsel %vm289_vm0, %v1643_v9, 0.0  ;;  %vm1492_vm10 = vcmp.lt.s32.totalorder %v1460_v31, 512  ;;  %v2230_v52 = vld [vmem:[%s2320_s11 + $0xf8] sm:$0xff] }
 0x296   : > { %v1693_v33 = vsel %vm289_vm0, %v1642_v19, 0.0  ;;  %v1613_v58 = vsel %vm1485_vm9, %v1517_v51, 0.0 }
 0x297   : > { %v1694_v41 = vadd.f32 %v1693_v33, %v1692_v54  ;;  %v1612_v59 = vsel %vm1484_vm11, %v1516_v47, 0.0  ;;  %v2153_v49 = vpop.f32.mrb[24].mxu1  ;;  %v1645_v34 = vmul.f32 %v1613_v58, %v1613_v58 }
 0x298   : > { %v1644_v10 = vmul.f32 %v1612_v59, %v1612_v59  ;;  %1215 = vst.msk [vmem:[%s2813_s29 + $0xc8] sm:$0xff] %vm289_vm0, %v2153_v49  ;;  %v1519_v50 = vsub.f32 %v2153_v49, %v2224_v60  ;;  %v1151_v62 = vpop.f32.mrb[25].mxu1 }
 0x299   : > { %v1696_v63 = vadd.f32 %v1695_v21, %v1694_v41  ;;  %1214 = vst.msk [vmem:[%s2813_s29 + $0xc0] sm:$0xff] %vm289_vm0, %v1151_v62  ;;  %v1518_v16 = vsub.f32 %v1151_v62, %v2225_v44  ;;  %v1699_v15 = vsel %vm289_vm0, %v1645_v34, 0.0 }
 0x29a   : > { %v1697_v53 = vsel %vm289_vm0, %v1644_v10, 0.0  ;;  %v1615_v2 = vsel %vm1487_vm12, %v1519_v50, 0.0 }
 0x29b   : > { %v1698_v56 = vadd.f32 %v1697_v53, %v1696_v63  ;;  %v1614_v57 = vsel %vm1486_vm15, %v1518_v16, 0.0  ;;  %v2156_v3 = vpop.f32.mrb[26].mxu1  ;;  %v1647_v7 = vmul.f32 %v1615_v2, %v1615_v2 }
 0x29c   : > { %v1646_v61 = vmul.f32 %v1614_v57, %v1614_v57  ;;  %1217 = vst.msk [vmem:[%s2813_s29 + $0xd8] sm:$0xff] %vm289_vm0, %v2156_v3  ;;  %v1521_v35 = vsub.f32 %v2156_v3, %v2226_v11  ;;  %v1161_v12 = vpop.f32.mrb[27].mxu1 }
 0x29d   : > { %v1700_v30 = vadd.f32 %v1699_v15, %v1698_v56  ;;  %1216 = vst.msk [vmem:[%s2813_s29 + $0xd0] sm:$0xff] %vm289_vm0, %v1161_v12  ;;  %v1520_v18 = vsub.f32 %v1161_v12, %v2227_v4  ;;  %v1703_v0 = vsel %vm289_vm0, %v1647_v7, 0.0 }
 0x29e   : > { %v1701_v13 = vsel %vm289_vm0, %v1646_v61, 0.0  ;;  %v1617_v27 = vsel %vm1489_vm1, %v1521_v35, 0.0 }
 0x29f   : > { %v1702_v39 = vadd.f32 %v1701_v13, %v1700_v30  ;;  %v1616_v28 = vsel %vm1488_vm3, %v1520_v18, 0.0  ;;  %v2159_v17 = vpop.f32.mrb[28].mxu1  ;;  %v1649_v1 = vmul.f32 %v1617_v27, %v1617_v27 }
 0x2a0   : > { %v1648_v25 = vmul.f32 %v1616_v28, %v1616_v28  ;;  %1219 = vst.msk [vmem:[%s2813_s29 + $0xe8] sm:$0xff] %vm289_vm0, %v2159_v17  ;;  %v1523_v45 = vsub.f32 %v2159_v17, %v2228_v40  ;;  %v1171_v36 = vpop.f32.mrb[29].mxu1 }
 0x2a1   : > { %v1704_v37 = vadd.f32 %v1703_v0, %v1702_v39  ;;  %1218 = vst.msk [vmem:[%s2813_s29 + $0xe0] sm:$0xff] %vm289_vm0, %v1171_v36  ;;  %v1522_v38 = vsub.f32 %v1171_v36, %v2229_v42  ;;  %v1707_v19 = vsel %vm289_vm0, %v1649_v1, 0.0 }
 0x2a2   : > { %v1705_v20 = vsel %vm289_vm0, %v1648_v25, 0.0  ;;  %v1619_v32 = vsel %vm1491_vm4, %v1523_v45, 0.0 }
 0x2a3   : > { %v1706_v5 = vadd.f32 %v1705_v20, %v1704_v37  ;;  %v1618_v46 = vsel %vm1490_vm6, %v1522_v38, 0.0  ;;  %v2162_v9 = vpop.f32.mrb[30].mxu1  ;;  %v1651_v43 = vmul.f32 %v1619_v32, %v1619_v32 }
 0x2a4   : > { %v1650_v51 = vmul.f32 %v1618_v46, %v1618_v46  ;;  %1221 = vst.msk [vmem:[%s2813_s29 + $0xf8] sm:$0xff] %vm289_vm0, %v2162_v9  ;;  %v1525_v54 = vsub.f32 %v2162_v9, %v2230_v52  ;;  %v1181_v26 = vpop.f32.mrb[31].mxu1 }
 0x2a5   : > { %v1708_v47 = vadd.f32 %v1707_v19, %v1706_v5  ;;  %1220 = vst.msk [vmem:[%s2813_s29 + $0xf0] sm:$0xff] %vm289_vm0, %v1181_v26  ;;  %v1524_v8 = vsub.f32 %v1181_v26, %v2231_v55  ;;  %v1711_v41 = vsel %vm289_vm0, %v1651_v43, 0.0 }
 0x2a6   : > { %v1709_v33 = vsel %vm289_vm0, %v1650_v51, 0.0  ;;  %v1621_v58 = vsel %vm1493_vm2, %v1525_v54, 0.0 }
 0x2a7   : > { %v1710_v14 = vadd.f32 %v1709_v33, %v1708_v47  ;;  %v1620_v22 = vsel %vm1492_vm10, %v1524_v8, 0.0  ;;  %v1653_v59 = vmul.f32 %v1621_v58, %v1621_v58 }
 0x2a8   : > { %v1652_v49 = vmul.f32 %v1620_v22, %v1620_v22 }
 0x2a9   : > { %v1712_v21 = vadd.f32 %v1711_v41, %v1710_v14  ;;  %v1715_v60 = vsel %vm289_vm0, %v1653_v59, 0.0 }
 0x2aa   : > { %v1713_v34 = vsel %vm289_vm0, %v1652_v49, 0.0 }
 0x2ab   : > { %v1714_v10 = vadd.f32 %v1713_v34, %v1712_v21 }
 0x2ad   : > { %v1716_v50 = vadd.f32 %v1715_v60, %v1714_v10 }
 0x2af   : > { %1717 = vst.msk [vmem:[%s248_s30] sm:$0xff] %vm289_vm0, %v1716_v50 }
 0x2b0 PF: > { %s16_s18 = sadd.s32 1, %s2238_s18  }
 0x2b1   : > { %p13_p5 = scmp.ge.s32.totalorder %s16_s18, 4  }
 0x2b3   :  { %15 = sbr.rel (!%p13_p5) target bundleno = 1 (0x1), region = 86 }

</bundles_post_ra>
